<compile_context>
chip_gen: v7x
topology: tpu7x:2x2x1
jax: 0.10.0
libtpu: 0.0.40
codegen_flags: <defaults>
</compile_context>

<pallas_src>
import math

import jax
import jax.numpy as jnp
from jax.experimental import pallas as pl
from jax.experimental.pallas import tpu as pltpu


def _round_up(a: int, b: int) -> int:
    return (a + b - 1) // b * b


def _cdiv(a: int, b: int) -> int:
    return (a + b - 1) // b


def _tpu_vmem_capacity() -> int:
    try:
        return int(pltpu.get_tpu_info().vmem_capacity_bytes)
    except Exception:
        return 64 * 1024 * 1024  # conservative (v7x per-TC VMEM)


def _vmem_estimate(tm: int, tv: int, dp: int, logits_bytes: int) -> int:
    """Rough VMEM footprint for one grid step (double-buffered I/O + scratch)."""
    return (2 * tm * dp * 4          # x tile, f32, double buffered
            + 2 * dp * tv * 2        # W1 tile, bf16
            + 2 * tv * dp * 2        # W2 tile, bf16
            + 2 * 8 * tv * 4         # b1 (sublane-padded)
            + 2 * 8 * dp * 4         # b2
            + 2 * tm * dp * 4        # out tile, f32
            + 2 * tm * tv * logits_bytes  # logits tile
            + tm * dp * 2)           # bf16 x scratch


def _plan(D: int, V: int, tile_m: int, tile_v: int,
          logits_bytes: int, budget: int):
    """Pick (tm_max, tv, Dp, Vp) given the VMEM budget."""
    Dp = _round_up(D, 128)
    Vp_full = _round_up(V, 128)
    tm = max(128, _round_up(tile_m, 8))

    # Preferred: full-vocab weight residency (weights DMA'd once, no V loop).
    if _vmem_estimate(tm, Vp_full, Dp, logits_bytes) <= budget:
        return tm, Vp_full, Dp, Vp_full

    tv = min(max(_round_up(tile_v, 128), 256), Vp_full)
    # Shrink tm first (weight re-streaming is the per-M-tile cost), then tv,
    # but keep tv >= 256 so the 256-wide MXU stays filled.
    while _vmem_estimate(tm, tv, Dp, logits_bytes) > budget and tm > 128:
        tm = max(128, _round_up(tm // 2, 8))
    while _vmem_estimate(tm, tv, Dp, logits_bytes) > budget and tv > 256:
        tv = max(256, _round_up(tv // 2, 128))

    # Re-split the padded vocab evenly to minimise dead padded work.
    nv = _cdiv(Vp_full, tv)
    tv = _round_up(_cdiv(Vp_full, nv), 128)
    Vp = tv * nv
    return tm, tv, Dp, Vp


def _interctc_kernel(x_ref, w1_ref, b1_ref, w2_ref, b2_ref,
                     out_ref, logits_ref, xbf_ref):
    # Grid: (M tiles ["parallel"], V tiles ["arbitrary", innermost]).
    #   x_ref:      (tm, Dp)  input dtype (same block for every v step)
    #   w1_ref:     (Dp, tv)  bf16        b1_ref: (1, tv) f32
    #   w2_ref:     (tv, Dp)  bf16        b2_ref: (1, Dp) f32
    #   out_ref:    (tm, Dp)  f32         (resident across v; used as the acc)
    #   logits_ref: (tm, tv)              (streamed per (i, v) tile)
    #   xbf_ref:    (tm, Dp)  bf16 scratch (x cast hoisted out of the v loop)
    v = pl.program_id(1)
    nv = pl.num_programs(1)

    @pl.when(v == 0)
    def _():
        xbf_ref[...] = x_ref[...].astype(jnp.bfloat16)
        out_ref[...] = jnp.zeros_like(out_ref)

    # proj1 for this V tile: logits = x @ W1[:, v-tile] + b1[v-tile]
    logits = jnp.dot(xbf_ref[...], w1_ref[...],
                     preferred_element_type=jnp.float32)
    logits = logits + b1_ref[...]                  # bias add in f32
    logits_ref[...] = logits.astype(logits_ref.dtype)

    # proj2 partial: out += logits[:, v-tile] @ W2[v-tile, :]  (f32 acc)
    out_ref[...] += jnp.dot(logits.astype(jnp.bfloat16), w2_ref[...],
                            preferred_element_type=jnp.float32)

    @pl.when(v == nv - 1)
    def _():
        out_ref[...] = out_ref[...] + x_ref[...] + b2_ref[...]


def prepare_inter_ctc_params(w1, b1, w2, b2, *, tile_m=512, tile_v=512,
                             logits_dtype=jnp.float32, vmem_budget=None):
    """Pad / cast the weights once (not every forward call).

    w1: (D, V), b1: (V,), w2: (V, D), b2: (D,) — weights stored as
    (in_features, out_features), i.e. the transpose of nn.Linear.weight.
    """
    D, V = w1.shape
    assert w2.shape == (V, D) and b1.shape == (V,) and b2.shape == (D,)
    logits_bytes = jnp.dtype(logits_dtype).itemsize
    cap = _tpu_vmem_capacity()
    budget = int(cap * 0.70) if vmem_budget is None else int(vmem_budget)

    tm_max, tv, Dp, Vp = _plan(D, V, tile_m, tile_v, logits_bytes, budget)

    def pad2(a, rows, cols, dtype):
        r, c = a.shape
        return jnp.pad(a.astype(dtype), ((0, rows - r), (0, cols - c)))

    return dict(
        w1p=pad2(w1, Dp, Vp, jnp.bfloat16),
        b1p=pad2(b1.reshape(1, V), 1, Vp, jnp.float32),
        w2p=pad2(w2, Vp, Dp, jnp.bfloat16),
        b2p=pad2(b2.reshape(1, D), 1, Dp, jnp.float32),
        D=D, V=V, Dp=Dp, Vp=Vp, tv=tv, tm_max=tm_max,
        logits_dtype=logits_dtype, vmem_cap=cap,
    )


def inter_ctc_block_apply(x, params):
    """x: (B, S, D) -> (out: (B, S, D), logits: (B, S, V))."""
    B, S, D = x.shape
    assert D == params["D"]
    V, Dp, Vp, tv = params["V"], params["Dp"], params["Vp"], params["tv"]
    logits_dtype = params["logits_dtype"]
    logits_bytes = jnp.dtype(logits_dtype).itemsize
    M = B * S

    # Per-call M tiling: large tiles, but guarantee >= 2 M tiles when M > 8 so
    # the "parallel" axis can shard across two TensorCores (v7x).
    tm = min(params["tm_max"], _round_up(M, 8))
    Mp = _round_up(M, tm)
    if Mp // tm < 2 and tm > 8:
        tm = _round_up(_cdiv(tm, 2), 8)
        Mp = _round_up(M, tm)

    x2 = jnp.pad(x.reshape(M, D), ((0, Mp - M), (0, Dp - D)))

    est = _vmem_estimate(tm, tv, Dp, logits_bytes)
    vmem_limit = int(min(params["vmem_cap"] - (2 << 20),
                         max(32 << 20, est + (8 << 20))))

    grid = (Mp // tm, Vp // tv)
    cost = pl.CostEstimate(
        flops=int(4 * Mp * Vp * Dp),
        transcendentals=0,
        bytes_accessed=int(Mp * Dp * (x.dtype.itemsize + 4)
                           + Mp * Vp * logits_bytes
                           + grid[0] * 2 * Dp * Vp * 2),
    )

    out2, logits2 = pl.pallas_call(
        _interctc_kernel,
        out_shape=(
            jax.ShapeDtypeStruct((Mp, Dp), jnp.float32),
            jax.ShapeDtypeStruct((Mp, Vp), logits_dtype),
        ),
        grid_spec=pltpu.PrefetchScalarGridSpec(
            num_scalar_prefetch=0,
            grid=grid,
            in_specs=[
                pl.BlockSpec((tm, Dp), lambda i, v: (i, 0)),   # x tile
                pl.BlockSpec((Dp, tv), lambda i, v: (0, v)),   # W1 V-tile
                pl.BlockSpec((1, tv), lambda i, v: (0, v)),    # b1 V-tile
                pl.BlockSpec((tv, Dp), lambda i, v: (v, 0)),   # W2 V-tile
                pl.BlockSpec((1, Dp), lambda i, v: (0, 0)),    # b2
            ],
            out_specs=[
                pl.BlockSpec((tm, Dp), lambda i, v: (i, 0)),   # out (acc over v)
                pl.BlockSpec((tm, tv), lambda i, v: (i, v)),   # logits tile
            ],
            scratch_shapes=[pltpu.VMEM((tm, Dp), jnp.bfloat16)],  # hoisted x cast
        ),
        compiler_params=pltpu.CompilerParams(
            dimension_semantics=("parallel", "arbitrary"),
            vmem_limit_bytes=vmem_limit),
        cost_estimate=cost,
    )(x2, params["w1p"], params["b1p"], params["w2p"], params["b2p"])

    out = out2[:M, :D].reshape(B, S, D).astype(x.dtype)
    logits = logits2[:M, :V].reshape(B, S, V)
    return out, logits


def inter_ctc_block(x, w1, b1, w2, b2, *, tile_m=512, tile_v=512,
                    logits_dtype=jnp.float32):
    """Convenience one-shot wrapper (prefers prepare_... + apply for reuse)."""
    params = prepare_inter_ctc_params(w1, b1, w2, b2, tile_m=tile_m,
                                      tile_v=tile_v, logits_dtype=logits_dtype)
    return inter_ctc_block_apply(x, params)


def _xavier_uniform(key, fan_in, fan_out, dtype=jnp.float32):
    # Matches nn.init.xavier_uniform_ (gain=1): U(-a, a), a = sqrt(6/(fan_in+fan_out))
    a = math.sqrt(6.0 / (fan_in + fan_out))
    # PyTorch weight is (out, in); we store the transpose (in, out).
    return jax.random.uniform(key, (fan_in, fan_out), dtype, minval=-a, maxval=a)


if __name__ == "__main__":
    B, S, D, V = 2, 8, 32, 48   # batch, seq, dim_model, vocab_size

    key = jax.random.PRNGKey(0)
    kx, kw1, kw2 = jax.random.split(key, 3)

    x = jax.random.normal(kx, (B, S, D), dtype=jnp.float32)

    # proj1: Linear(dim_model=D, vocab_size=V), xavier-uniform weight, zero bias
    w1 = _xavier_uniform(kw1, D, V)
    b1 = jnp.zeros((V,), dtype=jnp.float32)
    # proj2: Linear(vocab_size=V, dim_model=D)
    w2 = _xavier_uniform(kw2, V, D)
    b2 = jnp.zeros((D,), dtype=jnp.float32)

    params = prepare_inter_ctc_params(w1, b1, w2, b2)  # pad/cast weights once
    out, logits = inter_ctc_block_apply(x, params)
    out = jax.block_until_ready(out)
    logits = jax.block_until_ready(logits)

    # Pure-JAX f32 reference. The kernel uses bf16 MXU operands with f32
    # accumulation (also for logits @ W2), so compare with relaxed tolerances.
    ref_logits = x @ w1 + b1
    ref_out = x + ref_logits @ w2 + b2
    assert out.shape == (B, S, D) and logits.shape == (B, S, V)
    assert jnp.allclose(logits, ref_logits, atol=2e-2, rtol=2e-2), (
        float(jnp.max(jnp.abs(logits - ref_logits))))
    assert jnp.allclose(out, ref_out, atol=2e-2, rtol=2e-2), (
        float(jnp.max(jnp.abs(out - ref_out))))

    print("KERNEL_OK")
</pallas_src>

<mosaic_0001>
module attributes {stable_mosaic.version = 11 : i64} {
  func.func @_interctc_kernel(%arg0: i32, %arg1: i32, %arg2: memref<8x128xf32, #tpu.memory_space<vmem>>, %arg3: memref<128x128xbf16, #tpu.memory_space<vmem>>, %arg4: memref<1x128xf32, #tpu.memory_space<vmem>>, %arg5: memref<128x128xbf16, #tpu.memory_space<vmem>>, %arg6: memref<1x128xf32, #tpu.memory_space<vmem>>, %arg7: memref<8x128xf32, #tpu.memory_space<vmem>>, %arg8: memref<8x128xf32, #tpu.memory_space<vmem>>, %arg9: memref<8x128xbf16, #tpu.memory_space<vmem>>) attributes {dimension_semantics = [#tpu.dimension_semantics<parallel>, #tpu.dimension_semantics<arbitrary>], iteration_bounds = array<i64: 2, 1>, scalar_prefetch = 0 : i64, scratch_operands = 1 : i64, tpu.core_type = #tpu.core_type<tc>, window_params = [{transform_indices = @transform_0, window_bounds = array<i64: 8, 128>}, {transform_indices = @transform_1, window_bounds = array<i64: 128, 128>}, {transform_indices = @transform_2, window_bounds = array<i64: 1, 128>}, {transform_indices = @transform_3, window_bounds = array<i64: 128, 128>}, {pipeline_mode = #tpu.pipeline_mode<synchronous>, transform_indices = @transform_4, window_bounds = array<i64: 1, 128>}, {transform_indices = @transform_5, window_bounds = array<i64: 8, 128>}, {transform_indices = @transform_6, window_bounds = array<i64: 8, 128>}]} {
    %c0_i32 = arith.constant 0 : i32
    %0 = arith.cmpi eq, %arg1, %c0_i32 : i32
    %1 = arith.extui %0 : i1 to i32
    %c0_i32_0 = arith.constant 0 : i32
    %2 = arith.cmpi ne, %1, %c0_i32_0 : i32
    scf.if %2 {
      %c0_17 = arith.constant 0 : index
      %c0_18 = arith.constant 0 : index
      %19 = vector.load %arg2[%c0_17, %c0_18] : memref<8x128xf32, #tpu.memory_space<vmem>>, vector<8x128xf32>
      %20 = arith.truncf %19 : vector<8x128xf32> to vector<8x128xbf16>
      %c0_19 = arith.constant 0 : index
      %c0_20 = arith.constant 0 : index
      %21 = vector.load %arg9[%c0_19, %c0_20] : memref<8x128xbf16, #tpu.memory_space<vmem>>, vector<8x128xbf16>
      tpu.vector_store %arg9[%c0_19, %c0_20], %20 {strides = array<i32>} : memref<8x128xbf16, #tpu.memory_space<vmem>>, vector<8x128xbf16>,
      %cst_21 = arith.constant 0.000000e+00 : f32
      %22 = vector.broadcast %cst_21 : f32 to vector<8x128xf32>
      %c0_22 = arith.constant 0 : index
      %c0_23 = arith.constant 0 : index
      %23 = vector.load %arg7[%c0_22, %c0_23] : memref<8x128xf32, #tpu.memory_space<vmem>>, vector<8x128xf32>
      tpu.vector_store %arg7[%c0_22, %c0_23], %22 {strides = array<i32>} : memref<8x128xf32, #tpu.memory_space<vmem>>, vector<8x128xf32>,
    } else {
    }
    %c0 = arith.constant 0 : index
    %c0_1 = arith.constant 0 : index
    %3 = vector.load %arg9[%c0, %c0_1] : memref<8x128xbf16, #tpu.memory_space<vmem>>, vector<8x128xbf16>
    %c0_2 = arith.constant 0 : index
    %c0_3 = arith.constant 0 : index
    %4 = vector.load %arg3[%c0_2, %c0_3] : memref<128x128xbf16, #tpu.memory_space<vmem>>, vector<128x128xbf16>
    %cst = arith.constant dense<0.000000e+00> : vector<8x128xf32>
    %5 = tpu.matmul %3, %4, %cst {dimension_numbers = #tpu.dot_dimension_numbers<[1], [0], [0], [1], [0, 0, 1, 1], [], []>} : vector<8x128xbf16>, vector<128x128xbf16>, vector<8x128xf32> -> vector<8x128xf32>
    %c0_4 = arith.constant 0 : index
    %c0_5 = arith.constant 0 : index
    %6 = vector.load %arg4[%c0_4, %c0_5] : memref<1x128xf32, #tpu.memory_space<vmem>>, vector<1x128xf32>
    %7 = vector.broadcast %6 : vector<1x128xf32> to vector<8x128xf32>
    %8 = arith.addf %5, %7 : vector<8x128xf32>
    %c0_6 = arith.constant 0 : index
    %c0_7 = arith.constant 0 : index
    %9 = vector.load %arg8[%c0_6, %c0_7] : memref<8x128xf32, #tpu.memory_space<vmem>>, vector<8x128xf32>
    tpu.vector_store %arg8[%c0_6, %c0_7], %8 {strides = array<i32>} : memref<8x128xf32, #tpu.memory_space<vmem>>, vector<8x128xf32>,
    %c0_8 = arith.constant 0 : index
    %c0_9 = arith.constant 0 : index
    %10 = vector.load %arg7[%c0_8, %c0_9] : memref<8x128xf32, #tpu.memory_space<vmem>>, vector<8x128xf32>
    %11 = arith.truncf %8 : vector<8x128xf32> to vector<8x128xbf16>
    %c0_10 = arith.constant 0 : index
    %c0_11 = arith.constant 0 : index
    %12 = vector.load %arg5[%c0_10, %c0_11] : memref<128x128xbf16, #tpu.memory_space<vmem>>, vector<128x128xbf16>
    %cst_12 = arith.constant dense<0.000000e+00> : vector<8x128xf32>
    %13 = tpu.matmul %11, %12, %cst_12 {dimension_numbers = #tpu.dot_dimension_numbers<[1], [0], [0], [1], [0, 0, 1, 1], [], []>} : vector<8x128xbf16>, vector<128x128xbf16>, vector<8x128xf32> -> vector<8x128xf32>
    %14 = arith.addf %10, %13 : vector<8x128xf32>
    %c0_13 = arith.constant 0 : index
    %c0_14 = arith.constant 0 : index
    %15 = vector.load %arg7[%c0_13, %c0_14] : memref<8x128xf32, #tpu.memory_space<vmem>>, vector<8x128xf32>
    tpu.vector_store %arg7[%c0_13, %c0_14], %14 {strides = array<i32>} : memref<8x128xf32, #tpu.memory_space<vmem>>, vector<8x128xf32>,
    %c0_i32_15 = arith.constant 0 : i32
    %16 = arith.cmpi eq, %arg1, %c0_i32_15 : i32
    %17 = arith.extui %16 : i1 to i32
    %c0_i32_16 = arith.constant 0 : i32
    %18 = arith.cmpi ne, %17, %c0_i32_16 : i32
    scf.if %18 {
      %c0_17 = arith.constant 0 : index
      %c0_18 = arith.constant 0 : index
      %19 = vector.load %arg7[%c0_17, %c0_18] : memref<8x128xf32, #tpu.memory_space<vmem>>, vector<8x128xf32>
      %c0_19 = arith.constant 0 : index
      %c0_20 = arith.constant 0 : index
      %20 = vector.load %arg2[%c0_19, %c0_20] : memref<8x128xf32, #tpu.memory_space<vmem>>, vector<8x128xf32>
      %21 = arith.addf %19, %20 : vector<8x128xf32>
      %c0_21 = arith.constant 0 : index
      %c0_22 = arith.constant 0 : index
      %22 = vector.load %arg6[%c0_21, %c0_22] : memref<1x128xf32, #tpu.memory_space<vmem>>, vector<1x128xf32>
      %23 = vector.broadcast %22 : vector<1x128xf32> to vector<8x128xf32>
      %24 = arith.addf %21, %23 : vector<8x128xf32>
      %c0_23 = arith.constant 0 : index
      %c0_24 = arith.constant 0 : index
      %25 = vector.load %arg7[%c0_23, %c0_24] : memref<8x128xf32, #tpu.memory_space<vmem>>, vector<8x128xf32>
      tpu.vector_store %arg7[%c0_23, %c0_24], %24 {strides = array<i32>} : memref<8x128xf32, #tpu.memory_space<vmem>>, vector<8x128xf32>,
    } else {
    }
    return
  }
  func.func @transform_0(%arg0: i32, %arg1: i32) -> (i32, i32) {
    %c0_i32 = arith.constant 0 : i32
    %c0_i32_0 = arith.constant 0 : i32
    return %arg0, %c0_i32 : i32, i32
  }
  func.func @transform_1(%arg0: i32, %arg1: i32) -> (i32, i32) {
    %c0_i32 = arith.constant 0 : i32
    %c0_i32_0 = arith.constant 0 : i32
    return %c0_i32, %arg1 : i32, i32
  }
  func.func @transform_2(%arg0: i32, %arg1: i32) -> (i32, i32) {
    %c0_i32 = arith.constant 0 : i32
    %c0_i32_0 = arith.constant 0 : i32
    return %c0_i32, %arg1 : i32, i32
  }
  func.func @transform_3(%arg0: i32, %arg1: i32) -> (i32, i32) {
    %c0_i32 = arith.constant 0 : i32
    %c0_i32_0 = arith.constant 0 : i32
    return %arg1, %c0_i32 : i32, i32
  }
  func.func @transform_4(%arg0: i32, %arg1: i32) -> (i32, i32) {
    %c0_i32 = arith.constant 0 : i32
    %c0_i32_0 = arith.constant 0 : i32
    %c0_i32_1 = arith.constant 0 : i32
    return %c0_i32, %c0_i32_0 : i32, i32
  }
  func.func @transform_5(%arg0: i32, %arg1: i32) -> (i32, i32) {
    %c0_i32 = arith.constant 0 : i32
    %c0_i32_0 = arith.constant 0 : i32
    return %arg0, %c0_i32 : i32, i32
  }
  func.func @transform_6(%arg0: i32, %arg1: i32) -> (i32, i32) {
    %c0_i32 = arith.constant 0 : i32
    return %arg0, %arg1 : i32, i32
  }
}

</mosaic_0001>

<bundles_post_ra>
// kernel: tpu_custom_call.1
= control target key start
LH: loop header
LB: loop body
LE: loop exit
PB: predicated region body
PF: predicated region fallthrough
CT: control target
= control target key end

     0   :  { %12 = vsyncpa [#allocation4], 0  ;;  %s1523_s0 = inlined_call_operand.hbm [shape: f32[16,128], index: 0, kind: input, shape index: {}]   ;;  %s1524_s1 = inlined_call_operand.hbm [shape: bf16[128,128], index: 1, kind: input, shape index: {}]   ;;  %s1525_s2 = inlined_call_operand.vmem [shape: f32[1,128], index: 2, kind: input, shape index: {}]   ;;  %s1526_s3 = inlined_call_operand.hbm [shape: bf16[128,128], index: 3, kind: input, shape index: {}]   ;;  %s1527_s4 = inlined_call_operand.vmem [shape: f32[1,128], index: 4, kind: input, shape index: {}]   ;;  %s1528_s5 = inlined_call_operand.hbm [shape: f32[16,128], index: 5, kind: output, shape index: {0}]   ;;  %s1529_s6 = inlined_call_operand.hbm [shape: f32[16,128], index: 6, kind: output, shape index: {1}]  }
   0x1   :  { %14 = vsyncpa [#allocation4 + $0x1], 0 }
   0x2   :  { %15 = vsyncpa [#allocation7], 0 }
   0x3   :  { %16 = vsyncpa [#allocation5], 0 }
   0x4   :  { %18 = vsyncpa [#allocation5 + $0x1], 0 }
   0x5   :  { %19 = vsyncpa [#allocation11], 0 }
   0x6   :  { %21 = vsyncpa [#allocation11 + $0x1], 0  ;;  %s1230_s21 = smov 0   ;;  %s1232_s22 = smov 0  }
   0x7   :  { %s1234_s23 = smov 0   ;;  %s1236_s24 = smov 0  }
   0x8   :  { %s1238_s25 = smov 0   ;;  %s1240_s26 = smov 0  }
   0x9 LB: > { %s775_s27 = sadd.s32 4294967295, %s1184_s26   ;;  %s776_s28 = sadd.s32 4294967294, %s1184_s26   ;;  %s1184_s26 = sphi %s1240_s26, %s27_s26   ;;  %s1180_s25 = sphi %s1238_s25, %s1554_s25   ;;  %s1176_s24 = sphi %s1236_s24, %s1553_s24   ;;  %s1172_s23 = sphi %s1234_s23, %s1552_s23   ;;  %s1168_s22 = sphi %s1232_s22, %s1551_s22   ;;  %s1164_s21 = sphi %s1230_s21, %s1550_s21  }
   0xa   : > { %p59_p0 = scmp.ne.s32.totalorder %s1168_s22, %s1164_s21  ;;  %p1264_p1 = scmp.eq.s32.totalorder %s775_s27, 0 }
   0xb   : > { %p1268_p2 = scmp.eq.s32.totalorder %s775_s27, 1  ;;  %p188_p3 = scmp.eq.s32.totalorder %s776_s28, 1 }
   0xc   : > { %s1535_s29 = scalar_select %p1264_p1, 1, 0 }
   0xd   : > { %p1274_p4 = por %p1264_p1, %p59_p0  ;;  %p777_p5 = scmp.ge.s32.totalorder %s1184_s26, 1 }
   0xe   : > { %p1279_p6 = por %p188_p3, %p59_p0  ;;  %p223_p7 = scmp.lt.s32.totalorder %s1184_s26, 3 }
   0xf   : > { %s1537_s7 = scalar_select %p1274_p4, 1, 0 }
  0x10   : > { %s1538_s8 = scalar_select %p1279_p6, 1, 0 }
  0x11   : > { %p1284_p8 = pnand %p777_p5, %p223_p7  ;;  %s1186_s10 = smov [#allocation6]  }
  0x12   : > { %1539 = sst [smem:[#allocation16_spill]] %s1538_s8  ;;  %s237_s11 = sshll.u32 %s1186_s10, 4  ;;  %s1288_s11 = int_to_ptr.vmem [resolvable:$true] %s237_s11 }
  0x13   : > { %p886_p9 = pneg %p1284_p8  ;;  %s1187_s13 = smov [#allocation8]  }
  0x14   : > { %s259_s14 = sshll.u32 %s1187_s13, 4  ;;  %s980_s17 = scalar_lea.hbm %s1524_s1, 1024  ;;  %s1299_s14 = int_to_ptr.vmem [resolvable:$true] %s259_s14 }
  0x15   : > { %p1295_p11 = pnand %p886_p9, %p1264_p1  ;;  %p981_p12 = scmp.ne.s32.totalorder %s1524_s1, %s980_s17 }
  0x16   : > { %p987_p5 = scmp.lt.u32.totalorder %s980_s17, %s1524_s1 }
  0x17   : > { %p982_p13 = pneg %p1295_p11 }
  0x19   : > { %p983_p0 = pnand %p982_p13, %p981_p12 }
  0x1b   : > { %p984_p3 = pneg %p983_p0 }
  0x1d   : > { %p989_p7 = pnand %p987_p5, %p984_p3 }
  0x1f   : > { %992 = shalt.err (!%p989_p7)
}
  0x20   : > { %s993_s28 = scalar_lea.vmem %s1288_s11, 1024  ;;  %p1001_p1 = scmp.lt.s32.totalorder %s1288_s11, %s1288_s11 }
  0x21   : > { %p994_p9 = scmp.ne.s32.totalorder %s1288_s11, %s993_s28  ;;  %p1002_p12 = scmp.lt.s32.totalorder %s993_s28, %s993_s28 }
  0x23   : > { %p996_p10 = pnand %p994_p9, %p982_p13  ;;  %p1003_p0 = por %p1002_p12, %p1001_p1 }
  0x25   : > { %p997_p6 = pneg %p996_p10 }
  0x27   : > { %p1004_p4 = pnand %p1003_p0, %p997_p6 }
  0x29   : > { %1007 = shalt.err (!%p1004_p4)
}
  0x2a   : > { %s1188_s10 = smov 64   ;;  %s1189_s13 = smov 4  }
  0x2b   : > { %889 = dma.hbm_to_vmem [thread:$0]  (!%p1295_p11), %s1524_s1, 1024, %s1288_s11, [#allocation7], %s1188_s10, %s1188_s10, %s1189_s13  }
  0x2c   : > { %s1008_s19 = scalar_lea.hbm %s1526_s3, 1024 }
  0x2d   : > { %p1009_p1 = scmp.ne.s32.totalorder %s1526_s3, %s1008_s19  ;;  %p1015_p10 = scmp.lt.u32.totalorder %s1008_s19, %s1526_s3 }
  0x2f   : > { %p1011_p4 = pnand %p1009_p1, %p982_p13 }
  0x31   : > { %p1012_p6 = pneg %p1011_p4 }
  0x33   : > { %p1017_p3 = pnand %p1015_p10, %p1012_p6 }
  0x35   : > { %1020 = shalt.err (!%p1017_p3)
}
  0x36   : > { %s1021_s11 = scalar_lea.vmem %s1299_s14, 1024  ;;  %p1029_p12 = scmp.lt.s32.totalorder %s1299_s14, %s1299_s14 }
  0x37   : > { %p1022_p5 = scmp.ne.s32.totalorder %s1299_s14, %s1021_s11  ;;  %p1030_p0 = scmp.lt.s32.totalorder %s1021_s11, %s1021_s11 }
  0x39   : > { %p1024_p7 = pnand %p1022_p5, %p982_p13  ;;  %p1031_p1 = por %p1030_p0, %p1029_p12 }
  0x3b   : > { %p1025_p9 = pneg %p1024_p7 }
  0x3d   : > { %p1032_p4 = pnand %p1031_p1, %p1025_p9 }
  0x3f   : > { %1035 = shalt.err (!%p1032_p4)
}
  0x40   : > { %892 = dma.hbm_to_vmem [thread:$0]  (!%p1295_p11), %s1526_s3, 1024, %s1299_s14, [#allocation7], %s1188_s10, %s1188_s10, %s1189_s13  }
  0x41   : > { %s39_s16 = sadd.s32 1, %s1180_s25  ;;  %s46_s17 = sadd.s32 1, %s1172_s23 }
  0x42   : > { %p41_p13 = scmp.ge.s32.totalorder %s39_s16, 2  ;;  %p53_p6 = scmp.ne.s32.totalorder %s1172_s23, %s1168_s22 }
  0x43   : > { %p54_p10 = scmp.eq.s32.totalorder %s1184_s26, 0  ;;  %p906_p3 = scmp.lt.s32.totalorder %s1184_s26, 2 }
  0x44   : > { %s1556_s16 = smov (%p41_p13, %s39_s16), 0  ;;  %p1363_p7 = por %p1268_p2, %p53_p6 }
  0x45   : > { %p55_p5 = por %p54_p10, %p53_p6  ;;  %s43_s18 = ssub.s32 %s1180_s25, %s1556_s16 }
  0x46   : > { %s1542_s12 = scalar_select %p1363_p7, 1, 0 }
  0x47   : > { %s276_s19 = sand.u32 1, %s1172_s23   ;;  %p44_p9 = scmp.eq.s32.totalorder %s43_s18, 0 }
  0x48   : > { %s782_s14 = sshll.u32 %s276_s19, 3  ;;  %s783_s10 = sshll.u32 %s1180_s25, 7 }
  0x49   : > { %s1372_s13 = scalar_select %p44_p9, %s1172_s23, %s46_s17  }
  0x4a   : > { %s1377_s28 = scalar_lea.hbm %s1523_s0, %s783_s10  ;;  %s280_s30 = scalar_lea.vmem [#allocation3], %s782_s14 }
  0x4b   : > { %s287_s11 = sshll.u32 %s280_s30, 4  ;;  %p1381_p2 = pnand %p906_p3, %p55_p5  ;;  %s1385_s11 = int_to_ptr.vmem [resolvable:$true] %s287_s11 }
  0x4c   : > { %s277_s15 = scalar_lea.sflag [#allocation4], %s276_s19  ;;  %s1036_s17 = scalar_lea.hbm %s1377_s28, 128 }
  0x4d   : > { %p1037_p11 = scmp.ne.s32.totalorder %s1377_s28, %s1036_s17  ;;  %p1038_p12 = pneg %p1381_p2 }
  0x4e   : > { %s1041_s10 = scalar_lea.hbm %s1523_s0, 256  ;;  %p1042_p4 = scmp.lt.u32.totalorder %s1377_s28, %s1523_s0 }
  0x4f   : > { %p1039_p0 = pnand %p1038_p12, %p1037_p11  ;;  %p1043_p13 = scmp.lt.u32.totalorder %s1041_s10, %s1036_s17 }
  0x50   : > { %p1045_p10 = scmp.lt.u32.totalorder %s1036_s17, %s1377_s28 }
  0x51   : > { %p1040_p1 = pneg %p1039_p0  ;;  %p1044_p6 = por %p1043_p13, %p1042_p4 }
  0x53   : > { %p1046_p3 = por %p1045_p10, %p1044_p6 }
  0x55   : > { %p1047_p5 = pnand %p1046_p3, %p1040_p1 }
  0x57   : > { %1050 = shalt.err (!%p1047_p5)
}
  0x58   : > { %s1051_s19 = scalar_lea.vmem %s1385_s11, 128  ;;  %s1190_s30 = smov [#allocation3]  }
  0x59   : > { %p1052_p9 = scmp.ne.s32.totalorder %s1385_s11, %s1051_s19  ;;  %s1056_s18 = sshll.u32 %s1190_s30, 4  ;;  %s1057_s18 = int_to_ptr.vmem [resolvable:$false] %s1056_s18 }
  0x5a   : > { %s1058_s14 = scalar_lea.vmem %s1057_s18, 256  ;;  %p1059_p7 = scmp.lt.s32.totalorder %s1385_s11, %s1057_s18 }
  0x5b   : > { %p1054_p11 = pnand %p1052_p9, %p1038_p12  ;;  %p1060_p4 = scmp.lt.s32.totalorder %s1058_s14, %s1051_s19 }
  0x5d   : > { %p1055_p0 = pneg %p1054_p11  ;;  %p1061_p13 = por %p1060_p4, %p1059_p7 }
  0x5f   : > { %p1062_p6 = pnand %p1061_p13, %p1055_p0 }
  0x61   : > { %1065 = shalt.err (!%p1062_p6)
}
  0x62   : > { %896 = dma.hbm_to_vmem [thread:$0]  (!%p1381_p2), %s1377_s28, 128, %s1385_s11, %s277_s15  }
  0x63   : > { %296 = sbr.rel (%p1284_p8) target bundleno = 590 (0x24e), region = 40  ;;  %s1415_s17 = sand.u32 (!%p1284_p8), 1, %s1168_s22  }
  0x64   : > { %s1418_s10 = sshll.u32 (!%p1284_p8), %s1415_s17, 3  ;;  %s299_s20 = scalar_lea.sflag (!%p1284_p8), [#allocation4], %s1415_s17 }
  0x65   : > { %s302_s27 = scalar_lea.vmem (!%p1284_p8), [#allocation3], %s1418_s10  ;;  %p1544_p7 = scmp.ne.s32.totalorder (!%p1284_p8), %s1537_s7, 0 }
  0x6a   : > { %1147 = dma.done.wait (%p1544_p7), %s299_s20, 128  }
  0x6b   : > { %1149 = vsyncadd (%p1544_p7), %s299_s20, 4294967168  ;;  %p1545_p2 = scmp.ne.s32.totalorder %s1535_s29, 0 }
  0x6d   : > { %1151 = dma.done.wait (%p1545_p2), [#allocation7], 2048  }
  0x6e   : > { %1153 = vsyncadd (%p1545_p2), [#allocation7], 4294965248  ;;  %v1191_v0 = vmov 0.0   ;;  %vm1192_vm0 = vmmov 0   ;;  %v964_v1 = vld [vmem:[#allocation6] sm:$0xff]   ;;  %v965_v2 = vld [vmem:[#allocation6 + $0x8] sm:$0xff]  }
  0x6f   : > { %832 = vmatprep.subr.bf16.mxu0 %v1191_v0  ;;  %848 = vmatprep.mubr.msk.bf16.mxu0 %vm1192_vm0, %v1191_v0  ;;  %v966_v3 = vld [vmem:[#allocation6 + $0x10] sm:$0xff]   ;;  %v972_v6 = vld [vmem:[#allocation8] sm:$0xff]   ;;  %v967_v7 = vld [vmem:[#allocation6 + $0x18] sm:$0xff]   ;;  %s346_s9 = scalar_lea.vmem [#allocation10], %s1418_s10  ;;  %s810_s28 = sshll.u32 %s1176_s24, 7 }
  0x70   : > { %852 = vmatprep.subr.bf16.mxu1 %v1191_v0  ;;  %868 = vmatprep.mubr.msk.bf16.mxu1 %vm1192_vm0, %v1191_v0  ;;  %v1430_v4 = vld [vmem:[%s302_s27] sm:$0xff]  ;;  %v973_v8 = vld [vmem:[#allocation8 + $0x8] sm:$0xff]   ;;  %v968_v9 = vld [vmem:[#allocation6 + $0x20] sm:$0xff]   ;;  %s1444_s15 = scalar_lea.hbm %s1529_s6, %s810_s28  ;;  %s629_s19 = sshll.u32 %s346_s9, 4  ;;  %s630_s19 = int_to_ptr.vmem [resolvable:$true] %s629_s19 }
  0x71   : > { %833 = vmatpush3.bf16.msra.mxu0 %v964_v1  ;;  %v357_v5 = vpack.c.bf16 %v1430_v4, %v1430_v4  ;;  %853 = vmatpush3.bf16.msra.mxu1 %v972_v6  ;;  %v974_v10 = vld [vmem:[#allocation8 + $0x10] sm:$0xff]   ;;  %v969_v11 = vld [vmem:[#allocation6 + $0x28] sm:$0xff]   ;;  %v975_v12 = vld [vmem:[#allocation8 + $0x18] sm:$0xff]   ;;  %s602_s30 = scalar_lea.sflag [#allocation11], %s1415_s17  ;;  %s1066_s18 = scalar_lea.vmem %s630_s19, 128 }
  0x72   : > { %834 = vmatprep.subr.bf16.mxu0 %v1191_v0  ;;  %854 = vmatprep.subr.bf16.mxu1 %v1191_v0  ;;  %v970_v13 = vld [vmem:[#allocation6 + $0x30] sm:$0xff]   ;;  %v976_v14 = vld [vmem:[#allocation8 + $0x20] sm:$0xff]   ;;  %v971_v15 = vld [vmem:[#allocation6 + $0x38] sm:$0xff]   ;;  %p1067_p8 = scmp.ne.s32.totalorder %s630_s19, %s1066_s18  ;;  %p1546_p12 = scmp.ne.s32.totalorder %s1542_s12, 0 }
  0x73   : > { %358 = vst [vmem:[#allocation2] sm:$0xf] %v357_v5  ;;  %v977_v16 = vld [vmem:[#allocation8 + $0x28] sm:$0xff]   ;;  %v978_v18 = vld [vmem:[#allocation8 + $0x30] sm:$0xff]   ;;  %v979_v19 = vld [vmem:[#allocation8 + $0x38] sm:$0xff]   ;;  %s1193_s14 = smov [#allocation10]  }
  0x74   : > { %v790_v20 = vld [vmem:[%s1525_s2] ss:$0 sm:$0xff]  ;;  %p1068_p1 = pnand %p1067_p8, %p1546_p12  ;;  %s1070_s20 = sshll.u32 %s1193_s14, 4  ;;  %s1071_s20 = int_to_ptr.vmem [resolvable:$false] %s1070_s20 }
  0x75   : > { %835 = vmatpush3.bf16.msra.mxu0 %v965_v2  ;;  %855 = vmatpush3.bf16.msra.mxu1 %v973_v8  ;;  %s1072_s27 = scalar_lea.vmem %s1071_s20, 256  ;;  %p1073_p3 = scmp.lt.s32.totalorder %s630_s19, %s1071_s20 }
  0x76   : > { %836 = vmatprep.subr.bf16.mxu0 %v1191_v0  ;;  %856 = vmatprep.subr.bf16.mxu1 %v1191_v0  ;;  %p1069_p10 = pneg %p1068_p1  ;;  %p1074_p5 = scmp.lt.s32.totalorder %s1072_s27, %s1066_s18 }
  0x78   : > { %p1075_p9 = por %p1074_p5, %p1073_p3 }
  0x79   : > { %837 = vmatpush3.bf16.msra.mxu0 %v966_v3  ;;  %857 = vmatpush3.bf16.msra.mxu1 %v974_v10 }
  0x7a   : > { %838 = vmatprep.subr.bf16.mxu0 %v1191_v0  ;;  %858 = vmatprep.subr.bf16.mxu1 %v1191_v0  ;;  %v360_v17 = vld [vmem:[#allocation2] sm:$0xf]  ;;  %p1076_p11 = pnand %p1075_p9, %p1069_p10 }
  0x7d   : > { %839 = vmatpush3.bf16.msra.mxu0 %v967_v7  ;;  %859 = vmatpush3.bf16.msra.mxu1 %v975_v12 }
  0x7e   : > { %840 = vmatprep.subr.bf16.mxu0 %v1191_v0  ;;  %860 = vmatprep.subr.bf16.mxu1 %v1191_v0 }
  0x81   : > { %841 = vmatpush3.bf16.msra.mxu0 %v968_v9  ;;  %861 = vmatpush3.bf16.msra.mxu1 %v976_v14 }
  0x82   : > { %842 = vmatprep.subr.bf16.mxu0 %v1191_v0  ;;  %862 = vmatprep.subr.bf16.mxu1 %v1191_v0 }
  0x85   : > { %843 = vmatpush3.bf16.msra.mxu0 %v969_v11  ;;  %863 = vmatpush3.bf16.msra.mxu1 %v977_v16 }
  0x86   : > { %844 = vmatprep.subr.bf16.mxu0 %v1191_v0  ;;  %864 = vmatprep.subr.bf16.mxu1 %v1191_v0 }
  0x89   : > { %845 = vmatpush3.bf16.msra.mxu0 %v970_v13  ;;  %865 = vmatpush3.bf16.msra.mxu1 %v978_v18 }
  0x8a   : > { %846 = vmatprep.subr.bf16.mxu0 %v1191_v0  ;;  %866 = vmatprep.subr.bf16.mxu1 %v1191_v0 }
  0x8d   : > { %847 = vmatpush3.bf16.msra.mxu0 %v971_v15  ;;  %867 = vmatpush3.bf16.msra.mxu1 %v979_v19 }
  0x90   : > { %849 = vmatmul.mubr.bf16.vlgmr.msra.gmra.mrb[0].mxu0 %v360_v17 }
 0x163   : > { %v466_v21 = vpop.f32.mrb[0].mxu0 }
 0x164   : > { %v467_v22 = vadd.f32 %v790_v20, %v466_v21  ;;  %v850_v23 = vpop.f32.mrb[1].mxu0 }
 0x165   : > { %v469_v24 = vpop.f32.mrb[2].mxu0 }
 0x166   : > { %472 = vst [vmem:[%s346_s9] sm:$0xff] %v467_v22  ;;  %v474_v25 = vpack.c.bf16 %v467_v22, %v467_v22  ;;  %v851_v26 = vpop.f32.mrb[3].mxu0 }
 0x168   : > { %869 = vmatmul.mubr.bf16.vlgmr.msra.gmra.mrb[0].mxu1 %v474_v25 }
 0x169   : > { %1079 = shalt.err (!%p1076_p11)
}
 0x16a   : > { %s1080_s29 = scalar_lea.hbm %s1444_s15, 128  ;;  %s1084_s11 = scalar_lea.hbm %s1529_s6, 256 }
 0x16b   : > { %p1081_p0 = scmp.ne.s32.totalorder %s1444_s15, %s1080_s29  ;;  %p1085_p6 = scmp.lt.u32.totalorder %s1444_s15, %s1529_s6 }
 0x16c   : > { %p1086_p7 = scmp.lt.u32.totalorder %s1084_s11, %s1080_s29  ;;  %p1088_p8 = scmp.lt.u32.totalorder %s1080_s29, %s1444_s15 }
 0x16d   : > { %p1082_p4 = pnand %p1081_p0, %p1546_p12 }
 0x16e   : > { %p1087_p2 = por %p1086_p7, %p1085_p6 }
 0x16f   : > { %p1083_p13 = pneg %p1082_p4 }
 0x170   : > { %p1089_p1 = por %p1088_p8, %p1087_p2 }
 0x172   : > { %p1090_p10 = pnand %p1089_p1, %p1083_p13 }
 0x174   : > { %1093 = shalt.err (!%p1090_p10)
}
 0x175   : > { %883 = dma.vmem_to_hbm [thread:$0]  (%p1546_p12), %s630_s19, 128, %s1444_s15, %s602_s30   ;;  %v807_v30 = vld [vmem:[%s1527_s4] ss:$0 sm:$0xff] }
 0x176   : > { %s339_s27 = scalar_lea.vmem [#allocation9], %s1418_s10  ;;  %s1474_s11 = scalar_lea.hbm %s1528_s5, %s810_s28 }
 0x177   : > { %s615_s29 = sshll.u32 %s339_s27, 4  ;;  %s597_s15 = scalar_lea.sflag [#allocation5], %s1415_s17  ;;  %s1476_s29 = int_to_ptr.vmem [resolvable:$true] %s615_s29 }
 0x178   : > { %s1094_s19 = scalar_lea.vmem %s1476_s29, 128  ;;  %s1194_s10 = smov [#allocation9]  }
 0x179   : > { %p1095_p3 = scmp.ne.s32.totalorder %s1476_s29, %s1094_s19  ;;  %s1098_s30 = sshll.u32 %s1194_s10, 4  ;;  %s1099_s30 = int_to_ptr.vmem [resolvable:$false] %s1098_s30 }
 0x17a   : > { %s1100_s24 = scalar_lea.vmem %s1099_s30, 256  ;;  %p1101_p11 = scmp.lt.s32.totalorder %s1476_s29, %s1099_s30 }
 0x17b   : > { %p1096_p5 = pnand %p1095_p3, %p1546_p12  ;;  %p1102_p0 = scmp.lt.s32.totalorder %s1100_s24, %s1094_s19 }
 0x17d   : > { %p1097_p9 = pneg %p1096_p5  ;;  %p1103_p4 = por %p1102_p0, %p1101_p11 }
 0x17f   : > { %p1104_p13 = pnand %p1103_p4, %p1097_p9 }
 0x23b   : > { %v573_v27 = vpop.f32.mrb[0].mxu1 }
 0x23c   : > { %v870_v28 = vpop.f32.mrb[1].mxu1  ;;  %v586_v32 = vadd.f32 %v573_v27, %v1430_v4 }
 0x23d   : > { %v576_v29 = vpop.f32.mrb[2].mxu1 }
 0x23e   : > { %v871_v31 = vpop.f32.mrb[3].mxu1  ;;  %v594_v33 = vadd.f32 %v807_v30, %v586_v32 }
 0x240   : > { %595 = vst [vmem:[%s339_s27] sm:$0xff] %v594_v33 }
 0x241   : > { %1107 = shalt.err (!%p1104_p13)
}
 0x242   : > { %s1108_s17 = scalar_lea.hbm %s1474_s11, 128  ;;  %s1112_s14 = scalar_lea.hbm %s1528_s5, 256 }
 0x243   : > { %p1109_p6 = scmp.ne.s32.totalorder %s1474_s11, %s1108_s17  ;;  %p1113_p8 = scmp.lt.u32.totalorder %s1474_s11, %s1528_s5 }
 0x244   : > { %p1114_p1 = scmp.lt.u32.totalorder %s1112_s14, %s1108_s17  ;;  %p1116_p3 = scmp.lt.u32.totalorder %s1108_s17, %s1474_s11 }
 0x245   : > { %p1110_p7 = pnand %p1109_p6, %p1546_p12 }
 0x246   : > { %p1115_p10 = por %p1114_p1, %p1113_p8 }
 0x247   : > { %p1111_p2 = pneg %p1110_p7 }
 0x248   : > { %p1117_p5 = por %p1116_p3, %p1115_p10 }
 0x24a   : > { %p1118_p9 = pnand %p1117_p5, %p1111_p2 }
 0x24c   : > { %1121 = shalt.err (!%p1118_p9)
}
 0x24d   : > { %882 = dma.vmem_to_hbm [thread:$0]  (%p1546_p12), %s1476_s29, 128, %s1474_s11, %s597_s15  }
 0x24e PF: > { %s1547_s27 = sld [smem:[#allocation16_spill]]  ;;  %s641_s7 = sand.u32 1, %s1164_s21  }
 0x24f   : > { %p1549_p0 = scmp.ge.s32.totalorder %s1184_s26, 2  ;;  %s642_s9 = scalar_lea.sflag [#allocation5], %s641_s7 }
 0x254   : > { %p1548_p11 = scmp.ne.s32.totalorder %s1547_s27, 0 }
 0x256   : > { %p898_p4 = pnand %p1549_p0, %p1548_p11 }
 0x258   : > { %1155 = dma.done.wait (!%p898_p4), %s642_s9, 128  }
 0x259   : > { %1157 = vsyncadd (!%p898_p4), %s642_s9, 4294967168  ;;  %s651_s19 = scalar_lea.sflag [#allocation11], %s641_s7 }
 0x25a   : > { %1159 = dma.done.wait (!%p898_p4), %s651_s19, 128  }
 0x25b   : > { %1161 = vsyncadd (!%p898_p4), %s651_s19, 4294967168  ;;  %s27_s26 = sadd.s32 1, %s1184_s26   ;;  %s1550_s21 = smov %s1168_s22 }
 0x25c   : > { %p24_p13 = scmp.ge.s32.totalorder %s27_s26, 4   ;;  %s1551_s22 = smov %s1172_s23 }
 0x25d   : > { %s1552_s23 = smov %s1372_s13  ;;  %s1553_s24 = smov %s1180_s25 }
 0x25e   : > { %s1554_s25 = smov %s1556_s16  ;;  %26 = sbr.rel (!%p24_p13) target bundleno = 9 (0x9), region = 123 }
 0x265   :  { %656 = vsyncpa [#allocation4], 1 }
 0x266   :  { %658 = vsyncpa [#allocation4 + $0x1], 1 }
 0x267   :  { %659 = vsyncpa [#allocation7], 1 }
 0x268   :  { %660 = vsyncpa [#allocation5], 1 }
 0x269   :  { %662 = vsyncpa [#allocation5 + $0x1], 1 }
 0x26a   :  { %663 = vsyncpa [#allocation11], 1 }
 0x26b   :  { %665 = vsyncpa [#allocation11 + $0x1], 1 }

</bundles_post_ra>
